<compile_context>
chip_gen: v7x
topology: tpu7x:2x2x1
jax: 0.10.0
libtpu: 0.0.40
codegen_flags: <defaults>
</compile_context>

<pallas_src>
import functools

import jax
import jax.numpy as jnp
from jax.experimental import pallas as pl
from jax.experimental.pallas import tpu as pltpu


def _layernorm_kernel(x_ref, w_ref, b_ref, o_ref, *, eps, inv_h, valid_h):
    """One row-tile of TF-style LayerNorm.

    x_ref: (tile_rows, Hp) input block
    w_ref, b_ref: (1, Hp) f32 params (VMEM-resident, broadcast over rows)
    o_ref: (tile_rows, Hp) output block
    """
    hp = x_ref.shape[-1]
    x = x_ref[...].astype(jnp.float32)                     # (tile, Hp)
    # Row mean over the *real* hidden width (padded columns are zero, so a
    # plain sum with divisor H is exact).
    u = jnp.sum(x, axis=-1, keepdims=True) * inv_h
    d = x - u
    if valid_h != hp:
        # Zero the padded columns so they don't contribute to the variance.
        lane = jax.lax.broadcasted_iota(jnp.int32, (1, hp), 1)
        d = jnp.where(lane < valid_h, d, 0.0)
    s = jnp.sum(d * d, axis=-1, keepdims=True) * inv_h     # biased variance
    inv = jax.lax.rsqrt(s + eps)                           # eps inside sqrt (TF style)
    # Single fused expression: (w * (x - u)) * rsqrt(var + eps) + b.
    # Padded columns: d == 0 and w == b == 0, so output there is 0.
    o_ref[...] = (w_ref[...] * (d * inv) + b_ref[...]).astype(o_ref.dtype)


def _tpu_vmem_and_cores():
    """Physical VMEM bytes per TensorCore and a TC-count heuristic."""
    vmem = 64 * 1024 * 1024  # conservative fallback (v7x per-TC size)
    try:
        vmem = int(pltpu.get_tpu_info().vmem_capacity_bytes)
    except Exception:
        pass
    # v7x: 64 MiB VMEM/TC and 2 TCs per chip; v5e/v6e: 128 MiB and 1 TC.
    num_cores = 2 if vmem <= 64 * 1024 * 1024 else 1
    return vmem, num_cores


def _choose_tile_rows(R, Hp, in_bytes, out_bytes, vmem_capacity, num_cores):
    """Pick a sublane-aligned row-tile size.

    Goals: (a) >= ~8 MB of streamed in+out bytes per grid step, (b) total
    block footprint (double-buffered in/out + ~2 live f32 temps) within ~75%
    of physical VMEM, (c) >= ~4 grid steps per TensorCore when R is large
    enough for pipelining / megacore balance to matter.
    """
    budget = (vmem_capacity * 3) // 4          # 48 MiB on v7x, 96 MiB on v5e/v6e
    # Per row resident in VMEM: 2x double-buffered input + 2x double-buffered
    # output + ~2 live f32 temporaries inside the fused kernel body.
    per_row = 2 * Hp * (in_bytes + out_bytes) + 2 * Hp * 4
    vmem_rows = max(8, budget // per_row)

    # Mem-bound target: >= ~8 MB of in+out bytes per step so the ~0.35 us
    # fixed per-step overhead is negligible (matters most on v7x's faster HBM).
    target_rows = max(8, (8 * 1024 * 1024) // (Hp * (in_bytes + out_bytes)))

    t = min(vmem_rows, target_rows)

    # Keep >= ~4 steps per TensorCore so the DMA pipeline has overlap and both
    # v7x cores get balanced work -- unless R is trivially small anyway.
    min_steps = 4 * num_cores
    if R > min_steps * 8:
        t = min(t, pl.cdiv(R, min_steps))

    # Never allocate a tile larger than the whole (sublane-rounded) input.
    t = min(t, ((R + 7) // 8) * 8)
    t = max(8, (t // 8) * 8)                   # sublane (8) aligned
    return t


def xlnet_layer_norm(x, weight, bias, eps=1e-12, tile_rows=None):
    """x: (..., hidden); weight, bias: (hidden,). Matches XLNetLayerNorm.forward."""
    orig_shape = x.shape
    H = orig_shape[-1]
    x2 = x.reshape(-1, H)
    R = x2.shape[0]

    # Lane-density guard: pad hidden up to a multiple of 128 so the output
    # store is unmasked. Production hidden sizes (e.g. 1024) take the no-pad
    # path; the pad/slice copies only exist for odd hidden sizes.
    Hp = ((H + 127) // 128) * 128
    if Hp != H:
        x2 = jnp.pad(x2, ((0, 0), (0, Hp - H)))

    # Upcast params once on the host; constant index_map keeps them
    # VMEM-resident across all grid steps. Zero-pad so padded output cols = 0.
    w2 = weight.astype(jnp.float32).reshape(1, H)
    b2 = bias.astype(jnp.float32).reshape(1, H)
    if Hp != H:
        w2 = jnp.pad(w2, ((0, 0), (0, Hp - H)))
        b2 = jnp.pad(b2, ((0, 0), (0, Hp - H)))

    in_bytes = x2.dtype.itemsize
    out_bytes = in_bytes

    vmem_capacity, num_cores = _tpu_vmem_and_cores()
    if tile_rows is None:
        tile_rows = _choose_tile_rows(R, Hp, in_bytes, out_bytes,
                                      vmem_capacity, num_cores)

    grid_len = pl.cdiv(R, tile_rows)

    cost = pl.CostEstimate(
        flops=7 * R * Hp,                                   # sub/sq/sum/scale/affine
        transcendentals=R,                                  # one rsqrt per row
        bytes_accessed=R * Hp * (in_bytes + out_bytes) + 2 * Hp * 4,
    )

    kernel = functools.partial(_layernorm_kernel, eps=eps,
                               inv_h=1.0 / H, valid_h=H)

    out = pl.pallas_call(
        kernel,
        out_shape=jax.ShapeDtypeStruct((R, Hp), x.dtype),
        grid_spec=pltpu.PrefetchScalarGridSpec(
            num_scalar_prefetch=0,
            grid=(grid_len,),
            in_specs=[
                pl.BlockSpec((tile_rows, Hp), lambda i: (i, 0)),
                pl.BlockSpec((1, Hp), lambda i: (0, 0)),
                pl.BlockSpec((1, Hp), lambda i: (0, 0)),
            ],
            out_specs=pl.BlockSpec((tile_rows, Hp), lambda i: (i, 0)),
        ),
        compiler_params=pltpu.CompilerParams(
            dimension_semantics=("parallel",),
            # Leave headroom under physical VMEM (56 MiB on v7x, 112 MiB on
            # v5e/v6e) so double-buffering never degrades.
            vmem_limit_bytes=int(vmem_capacity * 7 // 8),
        ),
        cost_estimate=cost,
    )(x2, w2, b2)

    if Hp != H:
        out = out[:, :H]
    return out.reshape(orig_shape)


if __name__ == "__main__":
    key = jax.random.PRNGKey(0)
    batch, seq, hidden = 2, 8, 32

    # Deterministic parameter init matching nn.Parameter(torch.ones/zeros(hidden))
    weight = jnp.ones((hidden,), jnp.float32)
    bias = jnp.zeros((hidden,), jnp.float32)

    x = jax.random.normal(key, (batch, seq, hidden), dtype=jnp.float32)

    out = xlnet_layer_norm(x, weight, bias)
    out = jax.block_until_ready(out)

    # Reference check in plain JAX (same math as the PyTorch forward).
    u = jnp.mean(x, axis=-1, keepdims=True)
    s = jnp.mean((x - u) ** 2, axis=-1, keepdims=True)
    ref = weight * ((x - u) / jnp.sqrt(s + 1e-12)) + bias
    assert jnp.allclose(out, ref, atol=1e-5, rtol=1e-5), "mismatch vs reference"

    # Also exercise a non-divisible row count and a 128-multiple hidden
    # (no-pad production path) at tiny scale.
    x3 = jax.random.normal(jax.random.PRNGKey(1), (3, 5, 128), dtype=jnp.float32)
    w3 = jnp.ones((128,), jnp.float32)
    b3 = jnp.zeros((128,), jnp.float32)
    out3 = jax.block_until_ready(xlnet_layer_norm(x3, w3, b3))
    u3 = jnp.mean(x3, axis=-1, keepdims=True)
    s3 = jnp.mean((x3 - u3) ** 2, axis=-1, keepdims=True)
    ref3 = w3 * ((x3 - u3) / jnp.sqrt(s3 + 1e-12)) + b3
    assert jnp.allclose(out3, ref3, atol=1e-5, rtol=1e-5), "mismatch (H=128 path)"

    print("KERNEL_OK")
</pallas_src>

<mosaic_0001>
module attributes {stable_mosaic.version = 11 : i64} {
  func.func @_layernorm_kernel(%arg0: i32, %arg1: memref<16x128xf32, #tpu.memory_space<vmem>>, %arg2: memref<1x128xf32, #tpu.memory_space<vmem>>, %arg3: memref<1x128xf32, #tpu.memory_space<vmem>>, %arg4: memref<16x128xf32, #tpu.memory_space<vmem>>) attributes {dimension_semantics = [#tpu.dimension_semantics<parallel>], iteration_bounds = array<i64: 1>, scalar_prefetch = 0 : i64, scratch_operands = 0 : i64, tpu.core_type = #tpu.core_type<tc>, window_params = [{transform_indices = @transform_0, window_bounds = array<i64: 16, 128>}, {pipeline_mode = #tpu.pipeline_mode<synchronous>, transform_indices = @transform_1, window_bounds = array<i64: 1, 128>}, {pipeline_mode = #tpu.pipeline_mode<synchronous>, transform_indices = @transform_2, window_bounds = array<i64: 1, 128>}, {transform_indices = @transform_3, window_bounds = array<i64: 16, 128>}]} {
    %c0 = arith.constant 0 : index
    %c0_0 = arith.constant 0 : index
    %0 = vector.load %arg1[%c0, %c0_0] : memref<16x128xf32, #tpu.memory_space<vmem>>, vector<16x128xf32>
    %cst = arith.constant dense<0.000000e+00> : vector<16xf32>
    %1 = vector.multi_reduction <add>, %0, %cst [1] : vector<16x128xf32> to vector<16xf32>
    %2 = vector.shape_cast %1 : vector<16xf32> to vector<16x1xf32>
    %cst_1 = arith.constant 3.125000e-02 : f32
    %3 = vector.broadcast %cst_1 : f32 to vector<16x1xf32>
    %4 = arith.mulf %2, %3 : vector<16x1xf32>
    %5 = vector.broadcast %4 : vector<16x1xf32> to vector<16x128xf32>
    %6 = arith.subf %0, %5 : vector<16x128xf32>
    %7 = tpu.iota {dimensions = array<i32: 1>} : vector<1x128xi32>
    %c32_i32 = arith.constant 32 : i32
    %8 = vector.broadcast %c32_i32 : i32 to vector<1x128xi32>
    %9 = arith.cmpi slt, %7, %8 : vector<1x128xi32>
    %cst_2 = arith.constant 0.000000e+00 : f32
    %10 = vector.shape_cast %9 : vector<1x128xi1> to vector<1x128xi1>
    %11 = vector.broadcast %10 : vector<1x128xi1> to vector<16x128xi1>
    %12 = vector.broadcast %cst_2 : f32 to vector<16x128xf32>
    %13 = arith.select %11, %6, %12 : vector<16x128xi1>, vector<16x128xf32>
    %14 = arith.mulf %13, %13 : vector<16x128xf32>
    %cst_3 = arith.constant dense<0.000000e+00> : vector<16xf32>
    %15 = vector.multi_reduction <add>, %14, %cst_3 [1] : vector<16x128xf32> to vector<16xf32>
    %16 = vector.shape_cast %15 : vector<16xf32> to vector<16x1xf32>
    %cst_4 = arith.constant 3.125000e-02 : f32
    %17 = vector.broadcast %cst_4 : f32 to vector<16x1xf32>
    %18 = arith.mulf %16, %17 : vector<16x1xf32>
    %cst_5 = arith.constant 9.99999996E-13 : f32
    %19 = vector.broadcast %cst_5 : f32 to vector<16x1xf32>
    %20 = arith.addf %18, %19 : vector<16x1xf32>
    %21 = math.rsqrt %20 : vector<16x1xf32>
    %c0_6 = arith.constant 0 : index
    %c0_7 = arith.constant 0 : index
    %22 = vector.load %arg2[%c0_6, %c0_7] : memref<1x128xf32, #tpu.memory_space<vmem>>, vector<1x128xf32>
    %23 = vector.broadcast %21 : vector<16x1xf32> to vector<16x128xf32>
    %24 = arith.mulf %13, %23 : vector<16x128xf32>
    %25 = vector.broadcast %22 : vector<1x128xf32> to vector<16x128xf32>
    %26 = arith.mulf %25, %24 : vector<16x128xf32>
    %c0_8 = arith.constant 0 : index
    %c0_9 = arith.constant 0 : index
    %27 = vector.load %arg3[%c0_8, %c0_9] : memref<1x128xf32, #tpu.memory_space<vmem>>, vector<1x128xf32>
    %28 = vector.broadcast %27 : vector<1x128xf32> to vector<16x128xf32>
    %29 = arith.addf %26, %28 : vector<16x128xf32>
    %c0_10 = arith.constant 0 : index
    %c0_11 = arith.constant 0 : index
    %30 = vector.load %arg4[%c0_10, %c0_11] : memref<16x128xf32, #tpu.memory_space<vmem>>, vector<16x128xf32>
    tpu.vector_store %arg4[%c0_10, %c0_11], %29 {strides = array<i32>} : memref<16x128xf32, #tpu.memory_space<vmem>>, vector<16x128xf32>,
    return
  }
  func.func @transform_0(%arg0: i32) -> (i32, i32) {
    %c0_i32 = arith.constant 0 : i32
    %c0_i32_0 = arith.constant 0 : i32
    return %arg0, %c0_i32 : i32, i32
  }
  func.func @transform_1(%arg0: i32) -> (i32, i32) {
    %c0_i32 = arith.constant 0 : i32
    %c0_i32_0 = arith.constant 0 : i32
    %c0_i32_1 = arith.constant 0 : i32
    return %c0_i32, %c0_i32_0 : i32, i32
  }
  func.func @transform_2(%arg0: i32) -> (i32, i32) {
    %c0_i32 = arith.constant 0 : i32
    %c0_i32_0 = arith.constant 0 : i32
    %c0_i32_1 = arith.constant 0 : i32
    return %c0_i32, %c0_i32_0 : i32, i32
  }
  func.func @transform_3(%arg0: i32) -> (i32, i32) {
    %c0_i32 = arith.constant 0 : i32
    %c0_i32_0 = arith.constant 0 : i32
    return %arg0, %c0_i32 : i32, i32
  }
}

</mosaic_0001>

<bundles_post_ra>
// kernel: tpu_custom_call.1
= control target key start
LH: loop header
LB: loop body
LE: loop exit
PB: predicated region body
PF: predicated region fallthrough
CT: control target
= control target key end

     0   :  { %8 = vsyncpa [#allocation3], 0  ;;  %s215_s0 = inlined_call_operand.hbm [shape: f32[16,128], index: 0, kind: input, shape index: {}]   ;;  %s216_s1 = inlined_call_operand.vmem [shape: f32[1,128], index: 1, kind: input, shape index: {}]   ;;  %s217_s2 = inlined_call_operand.vmem [shape: f32[1,128], index: 2, kind: input, shape index: {}]   ;;  %s218_s3 = inlined_call_operand.hbm [shape: f32[16,128], index: 3, kind: output, shape index: {}]  }
   0x1   :  { %9 = vsyncpa [#allocation4], 0  ;;  %s155_s12 = smov [#allocation2]   ;;  %s107_s16 = scalar_lea.hbm %s215_s0, 256 }
   0x2   :  { %s15_s13 = sshll.u32 %s155_s12, 4  ;;  %p108_p0 = scmp.ne.s32.totalorder %s215_s0, %s107_s16  ;;  %s16_s13 = int_to_ptr.vmem [resolvable:$true] %s15_s13 }
   0x3   :  { %p111_p1 = scmp.lt.u32.totalorder %s107_s16, %s215_s0 }
   0x5   :  { %p113_p2 = pnand %p111_p1, %p108_p0 }
   0x7   :  { %116 = shalt.err (!%p113_p2)
}
   0x8   :  { %s117_s21 = scalar_lea.vmem %s16_s13, 256  ;;  %p122_p4 = scmp.lt.s32.totalorder %s16_s13, %s16_s13 }
   0x9   :  { %p118_p3 = scmp.ne.s32.totalorder %s16_s13, %s117_s21  ;;  %p123_p5 = scmp.lt.s32.totalorder %s117_s21, %s117_s21 }
   0xb   :  { %p124_p6 = por %p123_p5, %p122_p4 }
   0xd   :  { %p125_p7 = pnand %p124_p6, %p118_p3 }
   0xf   :  { %128 = shalt.err (!%p125_p7)
}
  0x10   :  { %s156_s22 = smov 128   ;;  %s157_s23 = smov 8  }
  0x11   :  { %21 = dma.hbm_to_vmem [thread:$0]  %s215_s0, 256, %s16_s13, [#allocation3], %s156_s22, %s156_s22, %s157_s23  }
  0x12   :  { %151 = dma.done.wait [#allocation3], 256  }
  0x13   :  { %152 = vsyncadd [#allocation3], 4294967040  ;;  %v29_v0 = vld [vmem:[#allocation2] sm:$0xff]  ;;  %v30_v1 = vld [vmem:[#allocation2 + $0x8] sm:$0xff]  ;;  %v39_v2 = vlaneseq  ;;  %s158_s29 = smov [#allocation5]  }
  0x14   :  { %31 = vadd.xlane.f32.xlu0 %v29_v0  ;;  %v97_v21 = vld [vmem:[%s216_s1] ss:$0 sm:$0xff]  ;;  %s85_s30 = sshll.u32 %s158_s29, 4  ;;  %s86_s30 = int_to_ptr.vmem [resolvable:$true] %s85_s30 }
  0x15   :  { %v40_v3 = vand.u32 127, %v39_v2  ;;  %v98_v23 = vld [vmem:[%s217_s2] ss:$0 sm:$0xff]  ;;  %s129_s4 = scalar_lea.vmem %s86_s30, 256  ;;  %p134_p9 = scmp.lt.s32.totalorder %s86_s30, %s86_s30 }
  0x16   :  { %p130_p8 = scmp.ne.s32.totalorder %s86_s30, %s129_s4  ;;  %p135_p10 = scmp.lt.s32.totalorder %s129_s4, %s129_s4 }
  0x17   :  { %vm41_vm0 = vcmp.lt.s32.totalorder %v40_v3, 32 }
  0x18   :  { %33 = vadd.xlane.f32.xlu0 %v30_v1  ;;  %p136_p11 = por %p135_p10, %p134_p9 }
  0x1a   :  { %p137_p12 = pnand %p136_p11, %p130_p8 }
  0xa1   :  { %v32_v4 = vpop.xlane.xlu0 %31 }
  0xa2   :  { %v35_v5 = vmul.f32 0.03125, %v32_v4 }
  0xa4   :  { %v37_v6 = vsub.f32 %v29_v0, %v35_v5 }
  0xa5   :  { %v34_v7 = vpop.xlane.xlu0 %33 }
  0xa6   :  { %v36_v8 = vmul.f32 0.03125, %v34_v7  ;;  %v44_v9 = vsel %vm41_vm0, %v37_v6, 0.0 }
  0xa7   :  { %v46_v10 = vmul.f32 %v44_v9, %v44_v9 }
  0xa8   :  { %v38_v11 = vsub.f32 %v30_v1, %v36_v8 }
  0xa9   :  { %48 = vadd.xlane.f32.xlu1 %v46_v10 }
  0xaa   :  { %v45_v12 = vsel %vm41_vm0, %v38_v11, 0.0 }
  0xab   :  { %v47_v13 = vmul.f32 %v45_v12, %v45_v12 }
  0xad   :  { %50 = vadd.xlane.f32.xlu1 %v47_v13 }
 0x136   :  { %v49_v14 = vpop.xlane.xlu1 %48 }
 0x137   :  { %v52_v15 = vmul.f32 0.03125, %v49_v14 }
 0x139   :  { %v54_v16 = vadd.f32 1e-12, %v52_v15 }
 0x13a   :  { %v51_v17 = vpop.xlane.xlu1 %50 }
 0x13b   :  { %103 = vrsqrt.f32 %v54_v16  ;;  %v53_v18 = vmul.f32 0.03125, %v51_v17 }
 0x13d   :  { %v55_v19 = vadd.f32 1e-12, %v53_v18 }
 0x13f   :  { %105 = vrsqrt.f32 %v55_v19 }
 0x145   :  { %v104_v20 = vpop.eup %103 }
 0x146   :  { %v59_v22 = vmul.f32 %v104_v20, %v44_v9 }
 0x148   :  { %v67_v24 = vmul.f32 %v97_v21, %v59_v22 }
 0x149   :  { %v106_v25 = vpop.eup %105 }
 0x14a   :  { %v60_v26 = vmul.f32 %v106_v25, %v45_v12  ;;  %v76_v27 = vadd.f32 %v98_v23, %v67_v24 }
 0x14c   :  { %v68_v28 = vmul.f32 %v97_v21, %v60_v26  ;;  %78 = vst [vmem:[#allocation5] sm:$0xff] %v76_v27 }
 0x14e   :  { %v77_v29 = vadd.f32 %v98_v23, %v68_v28 }
 0x150   :  { %79 = vst [vmem:[#allocation5 + $0x8] sm:$0xff] %v77_v29 }
 0x151   :  { %140 = shalt.err (!%p137_p12)
}
 0x152   :  { %s141_s5 = scalar_lea.hbm %s218_s3, 256 }
 0x153   :  { %p142_p13 = scmp.ne.s32.totalorder %s218_s3, %s141_s5  ;;  %p145_p0 = scmp.lt.u32.totalorder %s141_s5, %s218_s3 }
 0x155   :  { %p147_p1 = pnand %p145_p0, %p142_p13 }
 0x157   :  { %150 = shalt.err (!%p147_p1)
}
 0x158   :  { %91 = dma.vmem_to_hbm [thread:$0]  %s86_s30, 256, %s218_s3, [#allocation4], %s156_s22, %s156_s22, %s157_s23  }
 0x159   :  { %153 = dma.done.wait [#allocation4], 256  }
 0x15a   :  { %154 = vsyncadd [#allocation4], 4294967040 }
 0x15b   :  { %95 = vsyncpa [#allocation3], 1 }
 0x15c   :  { %96 = vsyncpa [#allocation4], 1 }

</bundles_post_ra>
